<compile_context>
chip_gen: v6e
topology: v6e:2x2x1
jax: 0.10.0
libtpu: 0.0.40
codegen_flags: <defaults>
</compile_context>

<pallas_src>
import jax
import jax.numpy as jnp
import numpy as np
from jax.experimental import pallas as pl
from jax.experimental.pallas import tpu as pltpu


def _broadcast_kernel(pe_ref, o_ref):
    # Steady state: pure lane-dense writeback. Sublane-broadcast the (1, C*HW)
    # slab across the batch tile and store.  No scratch, no pl.when, no
    # program_id dependence -> safe under "parallel" (megacore) semantics.
    o_ref[...] = jnp.broadcast_to(pe_ref[...], o_ref.shape)


def sine_positional_encodings(x, feature_dim, H, W, *, vmem_budget_bytes=24 << 20):
    """Pallas implementation of SinePositonnalEncodings(feature_dim, H, W)(x)."""
    if feature_dim % 2 != 0:
        # The PyTorch module effectively requires an even feature_dim
        # (row_embed + col_embed give 2 * (feature_dim // 2) channels).
        raise ValueError("feature_dim must be even")

    B = x.shape[0]
    half = feature_dim // 2
    C = feature_dim
    HW = H * W

    # ---- __init__-equivalent parameter setup (plain JAX glue, one-time) ----
    dim_t = jnp.arange(half, dtype=jnp.float32)
    dim_t = 10000.0 ** (2.0 * jnp.floor(dim_t / 2.0) / half)
    pos_x = 2.0 * jnp.pi * jnp.arange(H, dtype=jnp.float32) / H          # (H,)
    pos_y = 2.0 * jnp.pi * jnp.arange(W, dtype=jnp.float32) / W          # (W,)
    ax = pos_x[:, None] / dim_t                                          # (H, half)
    ay = pos_y[:, None] / dim_t                                          # (W, half)
    row_embed = jnp.concatenate([jnp.sin(ax[:, 0::2]), jnp.cos(ax[:, 1::2])], axis=1)  # (H, half)
    col_embed = jnp.concatenate([jnp.sin(ay[:, 0::2]), jnp.cos(ay[:, 1::2])], axis=1)  # (W, half)
    pe = jnp.concatenate(
        [
            jnp.broadcast_to(row_embed[:, None, :], (H, W, half)),
            jnp.broadcast_to(col_embed[None, :, :], (W and H, W, half)[0:1] and (H, W, half)),
        ],
        axis=2,
    )                                                                    # (H, W, C)
    pe = jnp.transpose(pe, (2, 0, 1)).reshape(1, C * HW)                 # lane-dense slab

    # ---- batch tiling: budget output double-buffer + resident input slab ----
    slab_bytes = C * HW * 4
    out_budget = max(2 * slab_bytes, vmem_budget_bytes - 2 * slab_bytes)
    bt_cap = max(1, out_budget // (2 * slab_bytes))     # output block is double-buffered
    if B <= bt_cap:
        Bt = B
    else:
        Bt = int(bt_cap)
        if Bt >= 8:
            Bt = (Bt // 8) * 8                          # sublane-aligned partial-batch block

    out = pl.pallas_call(
        _broadcast_kernel,
        out_shape=jax.ShapeDtypeStruct((B, C * HW), jnp.float32),
        grid=(pl.cdiv(B, Bt),),
        in_specs=[pl.BlockSpec((1, C * HW), lambda i: (0, 0))],          # resident constant slab
        out_specs=pl.BlockSpec((Bt, C * HW), lambda i: (i, 0)),          # lane-dense output tile
        compiler_params=pltpu.CompilerParams(
            # Stateless body -> batch tiles are independent; shard across the
            # two TensorCores on v7x, neutral on v5e/v6e.
            dimension_semantics=("parallel",),
            vmem_limit_bytes=32 << 20,
        ),
    )(pe)

    # Free metadata reshape back to NCHW.
    return out.reshape(B, C, H, W)


def reference(x, feature_dim, H, W):
    """Pure-JAX replica of the PyTorch module for verification."""
    B = x.shape[0]
    half = feature_dim // 2
    dim_t = jnp.arange(half, dtype=jnp.float32)
    dim_t = 10000.0 ** (2.0 * jnp.floor(dim_t / 2.0) / half)
    pos_x = 2.0 * jnp.pi * jnp.arange(H, dtype=jnp.float32) / H
    pos_y = 2.0 * jnp.pi * jnp.arange(W, dtype=jnp.float32) / W
    ax = pos_x[:, None] / dim_t
    ay = pos_y[:, None] / dim_t
    row_embed = jnp.concatenate([jnp.sin(ax[:, 0::2]), jnp.cos(ax[:, 1::2])], axis=1)  # (H, half)
    col_embed = jnp.concatenate([jnp.sin(ay[:, 0::2]), jnp.cos(ay[:, 1::2])], axis=1)  # (W, half)
    pe = jnp.concatenate(
        [
            jnp.broadcast_to(row_embed[:, None, :], (H, W, half)),
            jnp.broadcast_to(col_embed[None, :, :], (H, W, half)),
        ],
        axis=2,
    )                                                   # (H, W, C)
    pe = jnp.transpose(pe, (2, 0, 1))                   # (C, H, W)
    return jnp.broadcast_to(pe[None], (B, feature_dim, H, W)).astype(jnp.float32)


if __name__ == "__main__":
    B, C_in, H, W = 2, 4, 16, 16
    feature_dim = 32

    key = jax.random.PRNGKey(0)
    x = jax.random.normal(key, (B, C_in, H, W), dtype=jnp.float32)

    out = jax.block_until_ready(sine_positional_encodings(x, feature_dim, H, W))
    ref = jax.block_until_ready(reference(x, feature_dim, H, W))

    assert out.shape == (B, feature_dim, H, W)
    assert out.dtype == jnp.float32
    np.testing.assert_allclose(np.asarray(out), np.asarray(ref), rtol=1e-6, atol=1e-6)

    print("KERNEL_OK")
</pallas_src>

<mosaic_0001>
module attributes {stable_mosaic.version = 11 : i64} {
  func.func @_broadcast_kernel(%arg0: i32, %arg1: memref<1x8192xf32, #tpu.memory_space<vmem>>, %arg2: memref<2x8192xf32, #tpu.memory_space<vmem>>) attributes {dimension_semantics = [#tpu.dimension_semantics<parallel>], iteration_bounds = array<i64: 1>, scalar_prefetch = 0 : i64, scratch_operands = 0 : i64, tpu.core_type = #tpu.core_type<tc>, window_params = [{pipeline_mode = #tpu.pipeline_mode<synchronous>, transform_indices = @transform_0, window_bounds = array<i64: 1, 8192>}, {transform_indices = @transform_1, window_bounds = array<i64: 2, 8192>}]} {
    %c0 = arith.constant 0 : index
    %c0_0 = arith.constant 0 : index
    %0 = vector.load %arg1[%c0, %c0_0] : memref<1x8192xf32, #tpu.memory_space<vmem>>, vector<1x8192xf32>
    %1 = vector.shape_cast %0 : vector<1x8192xf32> to vector<1x8192xf32>
    %2 = vector.broadcast %1 : vector<1x8192xf32> to vector<2x8192xf32>
    %c0_1 = arith.constant 0 : index
    %c0_2 = arith.constant 0 : index
    %3 = vector.load %arg2[%c0_1, %c0_2] : memref<2x8192xf32, #tpu.memory_space<vmem>>, vector<2x8192xf32>
    tpu.vector_store %arg2[%c0_1, %c0_2], %2 {strides = array<i32>} : memref<2x8192xf32, #tpu.memory_space<vmem>>, vector<2x8192xf32>,
    return
  }
  func.func @transform_0(%arg0: i32) -> (i32, i32) {
    %c0_i32 = arith.constant 0 : i32
    %c0_i32_0 = arith.constant 0 : i32
    %c0_i32_1 = arith.constant 0 : i32
    return %c0_i32, %c0_i32_0 : i32, i32
  }
  func.func @transform_1(%arg0: i32) -> (i32, i32) {
    %c0_i32 = arith.constant 0 : i32
    %c0_i32_0 = arith.constant 0 : i32
    return %arg0, %c0_i32 : i32, i32
  }
}

</mosaic_0001>

<bundles_post_ra>
// kernel: tpu_custom_call.1
= control target key start
LH: loop header
LB: loop body
LE: loop exit
PB: predicated region body
PF: predicated region fallthrough
CT: control target
= control target key end

     0   :  { %6 = vsyncpa [#allocation3], 0  ;;  %s792_s0 = inlined_call_operand.hbm [shape: f32[1,8192], index: 0, kind: input, shape index: {}]   ;;  %s793_s1 = inlined_call_operand.hbm [shape: f32[2,8192], index: 1, kind: output, shape index: {}]  }
   0x1   :  { %7 = vsyncpa [#allocation4], 0  ;;  %s659_s6 = smov [#allocation2]  }
   0x2   :  { %s14_s7 = sshll.u32 %s659_s6, 4  ;;  %s15_s7 = int_to_ptr.vmem [resolvable:$true] %s14_s7 }
   0x3   :  { %s623_s8 = scalar_lea.vmem %s15_s7, 1024  ;;  %p628_p1 = scmp.lt.s32.totalorder %s15_s7, %s15_s7 }
   0x4   :  { %p624_p0 = scmp.ne.s32.totalorder %s15_s7, %s623_s8  ;;  %p629_p2 = scmp.lt.s32.totalorder %s623_s8, %s623_s8 }
   0x6   :  { %p630_p3 = por %p629_p2, %p628_p1 }
   0x8   :  { %p631_p4 = pnand %p630_p3, %p624_p0 }
   0xa   :  { %634 = shalt.err (!%p631_p4)
}
   0xb   :  { %17 = dma.hbm_to_vmem [thread:$0]  %s792_s0, 1024, %s15_s7, [#allocation3]  }
   0xc   :  { %655 = dma.done.wait [#allocation3], 1024  }
   0xd   :  { %656 = vsyncadd [#allocation3], 4294966272  ;;  %v37_v0 = vlaneseq  ;;  %v660_v1 = vmov 1983009808   ;;  %v21_v13 = vld [vmem:[#allocation2] sm:$0xff]  ;;  %v22_v15 = vld [vmem:[#allocation2 + $0x8] sm:$0xff] }
   0xe   :  { %v296_v2 = vunpack.c.l.s4 %v660_v1  ;;  %v23_v36 = vld [vmem:[#allocation2 + $0x10] sm:$0xff]  ;;  %v24_v53 = vld [vmem:[#allocation2 + $0x18] sm:$0xff]  ;;  %s661_s0 = smov [#allocation5]  }
   0xf   :  { %v38_v3 = vshrl.u32 %v37_v0, 7  ;;  %s603_s11 = sshll.u32 %s661_s0, 4  ;;  %s604_s11 = int_to_ptr.vmem [resolvable:$true] %s603_s11 }
  0x10   :  { %v297_v4 = vunpack.c.0.s8 %v296_v2  ;;  %s635_s12 = scalar_lea.vmem %s604_s11, 2048  ;;  %p640_p6 = scmp.lt.s32.totalorder %s604_s11, %s604_s11 }
  0x11   :  { %v675_v5 = vsub.s32 0, %v38_v3  ;;  %v677_v6 = vsub.s32 1, %v38_v3  ;;  %v679_v7 = vsub.s32 2, %v38_v3  ;;  %v681_v8 = vsub.s32 3, %v38_v3  ;;  %p636_p5 = scmp.ne.s32.totalorder %s604_s11, %s635_s12  ;;  %p641_p7 = scmp.lt.s32.totalorder %s635_s12, %s635_s12 }
  0x12   :  { %v683_v9 = vsub.s32 4, %v38_v3  ;;  %v685_v10 = vsub.s32 5, %v38_v3  ;;  %v687_v11 = vsub.s32 6, %v38_v3  ;;  %v689_v12 = vsub.s32 7, %v38_v3 }
  0x13   :  { %v691_v14 = vsub.s32 %v297_v4, %v38_v3  ;;  %v40_v16 = vrot.slane %v21_v13, %v675_v5  ;;  %v44_v17 = vrot.slane %v21_v13, %v677_v6  ;;  %v48_v18 = vrot.slane %v21_v13, %v679_v7  ;;  %p642_p8 = por %p641_p7, %p640_p6 }
  0x14   :  { %v52_v19 = vrot.slane %v21_v13, %v681_v8  ;;  %v56_v20 = vrot.slane %v21_v13, %v683_v9  ;;  %v60_v21 = vrot.slane %v21_v13, %v685_v10  ;;  %v64_v22 = vrot.slane %v21_v13, %v687_v11 }
  0x15   :  { %v68_v23 = vrot.slane %v21_v13, %v689_v12  ;;  %v293_v24 = vcombine.low %v40_v16, %v44_v17  ;;  %v72_v26 = vrot.slane %v22_v15, %v675_v5  ;;  %v76_v27 = vrot.slane %v22_v15, %v677_v6  ;;  %p643_p9 = pnand %p642_p8, %p636_p5 }
  0x16   :  { %v294_v25 = vcombine.low %v48_v18, %v52_v19  ;;  %v310_v28 = vcombine.low %v56_v20, %v60_v21  ;;  %v80_v30 = vrot.slane %v22_v15, %v679_v7  ;;  %v84_v31 = vrot.slane %v22_v15, %v681_v8  ;;  %v25_v19 = vld [vmem:[#allocation2 + $0x20] sm:$0xff] }
  0x17   :  { %v311_v29 = vcombine.low %v64_v22, %v68_v23  ;;  %v301_v32 = vrot.slane %v293_v24, %v691_v14  ;;  %v327_v34 = vcombine.low %v72_v26, %v76_v27  ;;  %v88_v35 = vrot.slane %v22_v15, %v683_v9 }
  0x18   :  { %v308_v33 = vrot.slane %v294_v25, %v691_v14  ;;  %v318_v37 = vrot.slane %v310_v28, %v691_v14  ;;  %v328_v39 = vcombine.low %v80_v30, %v84_v31  ;;  %v92_v40 = vrot.slane %v22_v15, %v685_v10 }
  0x19   :  { %v325_v38 = vrot.slane %v311_v29, %v691_v14  ;;  %v335_v42 = vrot.slane %v327_v34, %v691_v14  ;;  %v96_v43 = vrot.slane %v22_v15, %v687_v11  ;;  %v100_v44 = vrot.slane %v22_v15, %v689_v12 }
  0x1a   :  { %v309_v41 = vcombine.low %v301_v32, %v308_v33  ;;  %v342_v46 = vrot.slane %v328_v39, %v691_v14  ;;  %v344_v47 = vcombine.low %v88_v35, %v92_v40  ;;  %v104_v48 = vrot.slane %v23_v36, %v675_v5 }
  0x1b   :  { %v326_v45 = vcombine.low %v318_v37, %v325_v38  ;;  %v345_v49 = vcombine.low %v96_v43, %v100_v44  ;;  %v108_v50 = vrot.slane %v23_v36, %v677_v6  ;;  %v112_v51 = vrot.slane %v23_v36, %v679_v7 }
  0x1c   :  { %581 = vst [vmem:[#allocation5] sm:$0xff] %v309_v41  ;;  %v116_v52 = vrot.slane %v23_v36, %v681_v8  ;;  %v343_v54 = vcombine.low %v335_v42, %v342_v46  ;;  %v352_v55 = vrot.slane %v344_v47, %v691_v14  ;;  %v120_v56 = vrot.slane %v23_v36, %v683_v9 }
  0x1d   :  { %582 = vst [vmem:[#allocation5 + $0x8] sm:$0xff] %v326_v45  ;;  %v124_v57 = vrot.slane %v23_v36, %v685_v10  ;;  %v359_v58 = vrot.slane %v345_v49, %v691_v14  ;;  %v361_v59 = vcombine.low %v104_v48, %v108_v50  ;;  %v128_v61 = vrot.slane %v23_v36, %v687_v11 }
  0x1e   :  { %v362_v60 = vcombine.low %v112_v51, %v116_v52  ;;  %583 = vst [vmem:[#allocation5 + $0x10] sm:$0xff] %v343_v54  ;;  %v132_v62 = vrot.slane %v23_v36, %v689_v12  ;;  %v136_v0 = vrot.slane %v24_v53, %v675_v5  ;;  %v140_v1 = vrot.slane %v24_v53, %v677_v6  ;;  %v26_v36 = vld [vmem:[#allocation2 + $0x28] sm:$0xff] }
  0x1f   :  { %v378_v63 = vcombine.low %v120_v56, %v124_v57  ;;  %v360_v2 = vcombine.low %v352_v55, %v359_v58  ;;  %v369_v3 = vrot.slane %v361_v59, %v691_v14  ;;  %v144_v13 = vrot.slane %v24_v53, %v679_v7 }
  0x20   :  { %v376_v4 = vrot.slane %v362_v60, %v691_v14  ;;  %v379_v15 = vcombine.low %v128_v61, %v132_v62  ;;  %v148_v17 = vrot.slane %v24_v53, %v681_v8  ;;  %v395_v18 = vcombine.low %v136_v0, %v140_v1 }
  0x21   :  { %v386_v16 = vrot.slane %v378_v63, %v691_v14  ;;  %584 = vst [vmem:[#allocation5 + $0x18] sm:$0xff] %v360_v2  ;;  %v152_v21 = vrot.slane %v24_v53, %v683_v9  ;;  %v156_v22 = vrot.slane %v24_v53, %v685_v10  ;;  %v160_v23 = vrot.slane %v24_v53, %v687_v11 }
  0x22   :  { %v377_v20 = vcombine.low %v369_v3, %v376_v4  ;;  %v393_v24 = vrot.slane %v379_v15, %v691_v14  ;;  %v396_v25 = vcombine.low %v144_v13, %v148_v17  ;;  %v403_v26 = vrot.slane %v395_v18, %v691_v14 }
  0x23   :  { %v164_v27 = vrot.slane %v24_v53, %v689_v12  ;;  %v412_v28 = vcombine.low %v152_v21, %v156_v22  ;;  %v168_v29 = vrot.slane %v25_v19, %v675_v5  ;;  %v172_v30 = vrot.slane %v25_v19, %v677_v6  ;;  %v27_v53 = vld [vmem:[#allocation2 + $0x30] sm:$0xff] }
  0x24   :  { %585 = vst [vmem:[#allocation5 + $0x20] sm:$0xff] %v377_v20  ;;  %v176_v31 = vrot.slane %v25_v19, %v679_v7  ;;  %v394_v32 = vcombine.low %v386_v16, %v393_v24  ;;  %v410_v33 = vrot.slane %v396_v25, %v691_v14  ;;  %v180_v35 = vrot.slane %v25_v19, %v681_v8 }
  0x25   :  { %v413_v34 = vcombine.low %v160_v23, %v164_v27  ;;  %v420_v37 = vrot.slane %v412_v28, %v691_v14  ;;  %v429_v38 = vcombine.low %v168_v29, %v172_v30  ;;  %v184_v39 = vrot.slane %v25_v19, %v683_v9 }
  0x26   :  { %v188_v40 = vrot.slane %v25_v19, %v685_v10  ;;  %586 = vst [vmem:[#allocation5 + $0x28] sm:$0xff] %v394_v32  ;;  %v411_v41 = vcombine.low %v403_v26, %v410_v33  ;;  %v430_v43 = vcombine.low %v176_v31, %v180_v35  ;;  %v192_v44 = vrot.slane %v25_v19, %v687_v11 }
  0x27   :  { %v427_v42 = vrot.slane %v413_v34, %v691_v14  ;;  %v437_v45 = vrot.slane %v429_v38, %v691_v14  ;;  %v196_v46 = vrot.slane %v25_v19, %v689_v12  ;;  %v200_v48 = vrot.slane %v26_v36, %v675_v5  ;;  %v28_v19 = vld [vmem:[#allocation2 + $0x38] sm:$0xff] }
  0x28   :  { %v446_v47 = vcombine.low %v184_v39, %v188_v40  ;;  %587 = vst [vmem:[#allocation5 + $0x30] sm:$0xff] %v411_v41  ;;  %v444_v50 = vrot.slane %v430_v43, %v691_v14  ;;  %v204_v51 = vrot.slane %v26_v36, %v677_v6  ;;  %v208_v52 = vrot.slane %v26_v36, %v679_v7 }
  0x29   :  { %v428_v49 = vcombine.low %v420_v37, %v427_v42  ;;  %v447_v54 = vcombine.low %v192_v44, %v196_v46  ;;  %v212_v56 = vrot.slane %v26_v36, %v681_v8  ;;  %v216_v57 = vrot.slane %v26_v36, %v683_v9 }
  0x2a   :  { %v454_v55 = vrot.slane %v446_v47, %v691_v14  ;;  %v445_v58 = vcombine.low %v437_v45, %v444_v50  ;;  %v463_v59 = vcombine.low %v200_v48, %v204_v51  ;;  %v220_v60 = vrot.slane %v26_v36, %v685_v10 }
  0x2b   :  { %588 = vst [vmem:[#allocation5 + $0x38] sm:$0xff] %v428_v49  ;;  %v224_v61 = vrot.slane %v26_v36, %v687_v11  ;;  %v461_v62 = vrot.slane %v447_v54, %v691_v14  ;;  %v464_v63 = vcombine.low %v208_v52, %v212_v56  ;;  %v228_v0 = vrot.slane %v26_v36, %v689_v12 }
  0x2c   :  { %v232_v1 = vrot.slane %v27_v53, %v675_v5  ;;  %589 = vst [vmem:[#allocation5 + $0x40] sm:$0xff] %v445_v58  ;;  %v471_v2 = vrot.slane %v463_v59, %v691_v14  ;;  %v480_v3 = vcombine.low %v216_v57, %v220_v60  ;;  %v236_v4 = vrot.slane %v27_v53, %v677_v6 }
  0x2d   :  { %v240_v13 = vrot.slane %v27_v53, %v679_v7  ;;  %v462_v15 = vcombine.low %v454_v55, %v461_v62  ;;  %v478_v16 = vrot.slane %v464_v63, %v691_v14  ;;  %v481_v17 = vcombine.low %v224_v61, %v228_v0 }
  0x2e   :  { %v244_v18 = vrot.slane %v27_v53, %v681_v8  ;;  %v488_v20 = vrot.slane %v480_v3, %v691_v14  ;;  %v497_v21 = vcombine.low %v232_v1, %v236_v4  ;;  %v248_v22 = vrot.slane %v27_v53, %v683_v9 }
  0x2f   :  { %v252_v23 = vrot.slane %v27_v53, %v685_v10  ;;  %590 = vst [vmem:[#allocation5 + $0x48] sm:$0xff] %v462_v15  ;;  %v479_v24 = vcombine.low %v471_v2, %v478_v16  ;;  %v495_v25 = vrot.slane %v481_v17, %v691_v14  ;;  %v256_v27 = vrot.slane %v27_v53, %v687_v11 }
  0x30   :  { %v498_v26 = vcombine.low %v240_v13, %v244_v18  ;;  %v505_v28 = vrot.slane %v497_v21, %v691_v14  ;;  %v260_v29 = vrot.slane %v27_v53, %v689_v12  ;;  %v264_v31 = vrot.slane %v28_v19, %v675_v5 }
  0x31   :  { %v514_v30 = vcombine.low %v248_v22, %v252_v23  ;;  %591 = vst [vmem:[#allocation5 + $0x50] sm:$0xff] %v479_v24  ;;  %v496_v32 = vcombine.low %v488_v20, %v495_v25  ;;  %v268_v34 = vrot.slane %v28_v19, %v677_v6  ;;  %v272_v35 = vrot.slane %v28_v19, %v679_v7 }
  0x32   :  { %v512_v33 = vrot.slane %v498_v26, %v691_v14  ;;  %v515_v36 = vcombine.low %v256_v27, %v260_v29  ;;  %v276_v38 = vrot.slane %v28_v19, %v681_v8  ;;  %v280_v39 = vrot.slane %v28_v19, %v683_v9 }
  0x33   :  { %v522_v37 = vrot.slane %v514_v30, %v691_v14  ;;  %592 = vst [vmem:[#allocation5 + $0x58] sm:$0xff] %v496_v32  ;;  %v531_v41 = vcombine.low %v264_v31, %v268_v34  ;;  %v284_v5 = vrot.slane %v28_v19, %v685_v10  ;;  %v288_v42 = vrot.slane %v28_v19, %v687_v11 }
  0x34   :  { %v513_v40 = vcombine.low %v505_v28, %v512_v33  ;;  %v529_v43 = vrot.slane %v515_v36, %v691_v14  ;;  %v532_v44 = vcombine.low %v272_v35, %v276_v38  ;;  %v292_v6 = vrot.slane %v28_v19, %v689_v12 }
  0x35   :  { %v539_v7 = vrot.slane %v531_v41, %v691_v14  ;;  %v548_v45 = vcombine.low %v280_v39, %v284_v5 }
  0x36   :  { %593 = vst [vmem:[#allocation5 + $0x60] sm:$0xff] %v513_v40  ;;  %v530_v46 = vcombine.low %v522_v37, %v529_v43  ;;  %v546_v8 = vrot.slane %v532_v44, %v691_v14  ;;  %v549_v9 = vcombine.low %v288_v42, %v292_v6 }
  0x37   :  { %v556_v47 = vrot.slane %v548_v45, %v691_v14 }
  0x38   :  { %594 = vst [vmem:[#allocation5 + $0x68] sm:$0xff] %v530_v46  ;;  %v547_v10 = vcombine.low %v539_v7, %v546_v8  ;;  %v563_v11 = vrot.slane %v549_v9, %v691_v14 }
  0x3a   :  { %595 = vst [vmem:[#allocation5 + $0x70] sm:$0xff] %v547_v10  ;;  %v564_v48 = vcombine.low %v556_v47, %v563_v11 }
  0x3c   :  { %596 = vst [vmem:[#allocation5 + $0x78] sm:$0xff] %v564_v48 }
  0x3d   :  { %646 = shalt.err (!%p643_p9)
}
  0x3e   :  { %606 = dma.vmem_to_hbm [thread:$0]  %s604_s11, 2048, %s793_s1, [#allocation4]  }
  0x3f   :  { %657 = dma.done.wait [#allocation4], 2048  }
  0x40   :  { %658 = vsyncadd [#allocation4], 4294965248 }
  0x41   :  { %610 = vsyncpa [#allocation3], 1 }
  0x42   :  { %611 = vsyncpa [#allocation4], 1 }

</bundles_post_ra>
